<compile_context>
chip_gen: v6e
topology: v6e:2x2x1
jax: 0.10.0
libtpu: 0.0.40
codegen_flags: <defaults>
</compile_context>

<pallas_src>
import jax
import jax.numpy as jnp
from jax.experimental import pallas as pl
from jax.experimental.pallas import tpu as pltpu

VAR_EPS = 1e-10


def _dnet_loss_kernel(pred_ref, gt_ref, mask_ref, sum_ref, cnt_ref):
    # pred_ref: (1, 2, H, W) f32; gt_ref/mask_ref: (1, 1, H, W)
    mu = pred_ref[0, 0]                                # (H, W)
    var = jnp.maximum(pred_ref[0, 1], VAR_EPS)         # var[var < 1e-10] = 1e-10
    gt = gt_ref[0, 0]                                  # (H, W)
    m = mask_ref[0, 0].astype(jnp.float32)             # int8 -> f32 (cheap VPU op)

    diff = mu - gt
    inv_var = pl.reciprocal(var)                       # exact reciprocal (EUP) + mul
    nll = diff * diff * (0.5 * inv_var) + 0.5 * jnp.log(var)

    # Per-image partial sum / valid count; masked mean is done in the wrapper.
    sum_ref[...] = jnp.sum(nll * m).reshape(1, 1, 1)
    cnt_ref[...] = jnp.sum(m).reshape(1, 1, 1)


def dnet_loss_gaussian(pred, gt_depth, gt_depth_mask):
    """pred: (B, 2, H, W); gt_depth: (B, 1, H, W); gt_depth_mask: (B, 1, H, W) bool."""
    B, C, H, W = pred.shape
    assert C == 2, "pred must have 2 channels (mu, var)"

    if pred.dtype != jnp.float32:
        pred = pred.astype(jnp.float32)
    if gt_depth.dtype != jnp.float32:
        gt_depth = gt_depth.astype(jnp.float32)
    mask_i8 = gt_depth_mask.astype(jnp.int8)           # 1 byte/elem on the wire

    sum_parts, cnt_parts = pl.pallas_call(
        _dnet_loss_kernel,
        out_shape=(jax.ShapeDtypeStruct((B, 1, 1), jnp.float32),
                   jax.ShapeDtypeStruct((B, 1, 1), jnp.float32)),
        grid_spec=pltpu.PrefetchScalarGridSpec(
            num_scalar_prefetch=0,
            grid=(B,),
            in_specs=[
                pl.BlockSpec((1, 2, H, W), lambda b: (b, 0, 0, 0)),   # pred (mu+var)
                pl.BlockSpec((1, 1, H, W), lambda b: (b, 0, 0, 0)),   # gt_depth
                pl.BlockSpec((1, 1, H, W), lambda b: (b, 0, 0, 0)),   # mask (int8)
            ],
            out_specs=[
                pl.BlockSpec((1, 1, 1), lambda b: (b, 0, 0)),         # per-image sum
                pl.BlockSpec((1, 1, 1), lambda b: (b, 0, 0)),         # per-image count
            ],
        ),
        compiler_params=pltpu.CompilerParams(
            dimension_semantics=("parallel",)),
    )(pred, gt_depth, mask_i8)

    # mean over masked elements == sum(nll * mask) / sum(mask)
    return jnp.sum(sum_parts) / jnp.sum(cnt_parts)


def _reference(pred, gt_depth, gt_depth_mask):
    mu = pred[:, 0]
    var = jnp.maximum(pred[:, 1], VAR_EPS)
    gt = gt_depth[:, 0]
    m = gt_depth_mask[:, 0]
    nll = jnp.square(mu - gt) / (2.0 * var) + 0.5 * jnp.log(var)
    return jnp.sum(jnp.where(m, nll, 0.0)) / jnp.sum(m.astype(jnp.float32))


if __name__ == "__main__":
    key = jax.random.PRNGKey(0)
    k1, k2, k3 = jax.random.split(key, 3)

    B, H, W = 2, 16, 16
    pred = jax.random.normal(k1, (B, 2, H, W), dtype=jnp.float32)
    # make var channel mostly positive (tiny values exercise the clamp)
    pred = pred.at[:, 1].set(jnp.abs(pred[:, 1]) * 0.5)
    gt_depth = jax.random.normal(k2, (B, 1, H, W), dtype=jnp.float32)
    gt_depth_mask = jax.random.bernoulli(k3, 0.7, (B, 1, H, W))

    loss = dnet_loss_gaussian(pred, gt_depth, gt_depth_mask)
    jax.block_until_ready(loss)

    ref = _reference(pred, gt_depth, gt_depth_mask)
    assert jnp.allclose(loss, ref, rtol=1e-5, atol=1e-5), (loss, ref)

    print("KERNEL_OK")
</pallas_src>

<mosaic_0001>
module attributes {stable_mosaic.version = 11 : i64} {
  func.func @_dnet_loss_kernel(%arg0: i32, %arg1: memref<1x2x16x16xf32, #tpu.memory_space<vmem>>, %arg2: memref<1x1x16x16xf32, #tpu.memory_space<vmem>>, %arg3: memref<1x1x16x16xi8, #tpu.memory_space<vmem>>, %arg4: memref<1x1x1xf32, #tpu.memory_space<vmem>>, %arg5: memref<1x1x1xf32, #tpu.memory_space<vmem>>) attributes {dimension_semantics = [#tpu.dimension_semantics<parallel>], iteration_bounds = array<i64: 2>, scalar_prefetch = 0 : i64, scratch_operands = 0 : i64, tpu.core_type = #tpu.core_type<tc>, window_params = [{transform_indices = @transform_0, window_bounds = array<i64: 1, 2, 16, 16>}, {transform_indices = @transform_1, window_bounds = array<i64: 1, 1, 16, 16>}, {transform_indices = @transform_2, window_bounds = array<i64: 1, 1, 16, 16>}, {transform_indices = @transform_3, window_bounds = array<i64: 1, 1, 1>}, {transform_indices = @transform_4, window_bounds = array<i64: 1, 1, 1>}]} {
    %c0 = arith.constant 0 : index
    %c0_0 = arith.constant 0 : index
    %c0_1 = arith.constant 0 : index
    %c0_2 = arith.constant 0 : index
    %0 = vector.load %arg1[%c0, %c0_0, %c0_1, %c0_2] : memref<1x2x16x16xf32, #tpu.memory_space<vmem>>, vector<1x1x16x16xf32>
    %1 = vector.shape_cast %0 : vector<1x1x16x16xf32> to vector<16x16xf32>
    %c0_3 = arith.constant 0 : index
    %c1 = arith.constant 1 : index
    %c0_4 = arith.constant 0 : index
    %c0_5 = arith.constant 0 : index
    %2 = vector.load %arg1[%c0_3, %c1, %c0_4, %c0_5] : memref<1x2x16x16xf32, #tpu.memory_space<vmem>>, vector<1x1x16x16xf32>
    %3 = vector.shape_cast %2 : vector<1x1x16x16xf32> to vector<16x16xf32>
    %cst = arith.constant 1.000000e-10 : f32
    %4 = vector.broadcast %cst : f32 to vector<16x16xf32>
    %5 = arith.maximumf %3, %4 : vector<16x16xf32>
    %c0_6 = arith.constant 0 : index
    %c0_7 = arith.constant 0 : index
    %c0_8 = arith.constant 0 : index
    %c0_9 = arith.constant 0 : index
    %6 = vector.load %arg2[%c0_6, %c0_7, %c0_8, %c0_9] : memref<1x1x16x16xf32, #tpu.memory_space<vmem>>, vector<1x1x16x16xf32>
    %7 = vector.shape_cast %6 : vector<1x1x16x16xf32> to vector<16x16xf32>
    %c0_10 = arith.constant 0 : index
    %c0_11 = arith.constant 0 : index
    %c0_12 = arith.constant 0 : index
    %c0_13 = arith.constant 0 : index
    %8 = vector.load %arg3[%c0_10, %c0_11, %c0_12, %c0_13] : memref<1x1x16x16xi8, #tpu.memory_space<vmem>>, vector<1x1x16x16xi8>
    %9 = vector.shape_cast %8 : vector<1x1x16x16xi8> to vector<16x16xi8>
    %10 = arith.sitofp %9 : vector<16x16xi8> to vector<16x16xf32>
    %11 = arith.subf %1, %7 : vector<16x16xf32>
    %12 = tpu.reciprocal %5 : vector<16x16xf32> -> vector<16x16xf32>
    %13 = arith.mulf %11, %11 : vector<16x16xf32>
    %cst_14 = arith.constant 5.000000e-01 : f32
    %14 = vector.broadcast %cst_14 : f32 to vector<16x16xf32>
    %15 = arith.mulf %14, %12 : vector<16x16xf32>
    %16 = arith.mulf %13, %15 : vector<16x16xf32>
    %17 = math.log %5 : vector<16x16xf32>
    %cst_15 = arith.constant 5.000000e-01 : f32
    %18 = vector.broadcast %cst_15 : f32 to vector<16x16xf32>
    %19 = arith.mulf %18, %17 : vector<16x16xf32>
    %20 = arith.addf %16, %19 : vector<16x16xf32>
    %21 = arith.mulf %20, %10 : vector<16x16xf32>
    %22 = vector.shape_cast %21 : vector<16x16xf32> to vector<1x16x16xf32>
    %cst_16 = arith.constant dense<0.000000e+00> : vector<1xf32>
    %23 = vector.multi_reduction <add>, %22, %cst_16 [1, 2] : vector<1x16x16xf32> to vector<1xf32>
    %24 = vector.shape_cast %23 : vector<1xf32> to vector<1x1x1xf32>
    %25 = vector.extract %24[0, 0, 0] : f32 from vector<1x1x1xf32>
    %26 = vector.broadcast %25 : f32 to vector<1x1x1xf32>
    %c0_17 = arith.constant 0 : index
    %c0_18 = arith.constant 0 : index
    %c0_19 = arith.constant 0 : index
    %27 = vector.load %arg4[%c0_17, %c0_18, %c0_19] : memref<1x1x1xf32, #tpu.memory_space<vmem>>, vector<1x1x1xf32>
    tpu.vector_store %arg4[%c0_17, %c0_18, %c0_19], %26 {strides = array<i32>} : memref<1x1x1xf32, #tpu.memory_space<vmem>>, vector<1x1x1xf32>,
    %28 = vector.shape_cast %10 : vector<16x16xf32> to vector<1x16x16xf32>
    %cst_20 = arith.constant dense<0.000000e+00> : vector<1xf32>
    %29 = vector.multi_reduction <add>, %28, %cst_20 [1, 2] : vector<1x16x16xf32> to vector<1xf32>
    %30 = vector.shape_cast %29 : vector<1xf32> to vector<1x1x1xf32>
    %31 = vector.extract %30[0, 0, 0] : f32 from vector<1x1x1xf32>
    %32 = vector.broadcast %31 : f32 to vector<1x1x1xf32>
    %c0_21 = arith.constant 0 : index
    %c0_22 = arith.constant 0 : index
    %c0_23 = arith.constant 0 : index
    %33 = vector.load %arg5[%c0_21, %c0_22, %c0_23] : memref<1x1x1xf32, #tpu.memory_space<vmem>>, vector<1x1x1xf32>
    tpu.vector_store %arg5[%c0_21, %c0_22, %c0_23], %32 {strides = array<i32>} : memref<1x1x1xf32, #tpu.memory_space<vmem>>, vector<1x1x1xf32>,
    return
  }
  func.func @transform_0(%arg0: i32) -> (i32, i32, i32, i32) {
    %c0_i32 = arith.constant 0 : i32
    %c0_i32_0 = arith.constant 0 : i32
    %c0_i32_1 = arith.constant 0 : i32
    %c0_i32_2 = arith.constant 0 : i32
    return %arg0, %c0_i32, %c0_i32_0, %c0_i32_1 : i32, i32, i32, i32
  }
  func.func @transform_1(%arg0: i32) -> (i32, i32, i32, i32) {
    %c0_i32 = arith.constant 0 : i32
    %c0_i32_0 = arith.constant 0 : i32
    %c0_i32_1 = arith.constant 0 : i32
    %c0_i32_2 = arith.constant 0 : i32
    return %arg0, %c0_i32, %c0_i32_0, %c0_i32_1 : i32, i32, i32, i32
  }
  func.func @transform_2(%arg0: i32) -> (i32, i32, i32, i32) {
    %c0_i32 = arith.constant 0 : i32
    %c0_i32_0 = arith.constant 0 : i32
    %c0_i32_1 = arith.constant 0 : i32
    %c0_i32_2 = arith.constant 0 : i32
    return %arg0, %c0_i32, %c0_i32_0, %c0_i32_1 : i32, i32, i32, i32
  }
  func.func @transform_3(%arg0: i32) -> (i32, i32, i32) {
    %c0_i32 = arith.constant 0 : i32
    %c0_i32_0 = arith.constant 0 : i32
    %c0_i32_1 = arith.constant 0 : i32
    return %arg0, %c0_i32, %c0_i32_0 : i32, i32, i32
  }
  func.func @transform_4(%arg0: i32) -> (i32, i32, i32) {
    %c0_i32 = arith.constant 0 : i32
    %c0_i32_0 = arith.constant 0 : i32
    %c0_i32_1 = arith.constant 0 : i32
    return %arg0, %c0_i32, %c0_i32_0 : i32, i32, i32
  }
}

</mosaic_0001>

<bundles_post_ra>
// kernel: tpu_custom_call.1
= control target key start
LH: loop header
LB: loop body
LE: loop exit
PB: predicated region body
PF: predicated region fallthrough
CT: control target
= control target key end

     0   :  { %10 = vsyncpa [#allocation3], 0  ;;  %s937_s0 = inlined_call_operand.hbm [shape: f32[2,2,16,16], index: 0, kind: input, shape index: {}]   ;;  %s938_s1 = inlined_call_operand.hbm [shape: f32[2,1,16,16], index: 1, kind: input, shape index: {}]   ;;  %s939_s2 = inlined_call_operand.hbm [shape: s8[2,1,16,16], index: 2, kind: input, shape index: {}]   ;;  %s940_s3 = inlined_call_operand.vmem [shape: f32[2,1,1], index: 3, kind: output, shape index: {0}]   ;;  %s941_s4 = inlined_call_operand.vmem [shape: f32[2,1,1], index: 4, kind: output, shape index: {1}]  }
   0x1   :  { %12 = vsyncpa [#allocation3 + $0x1], 0 }
   0x2   :  { %13 = vsyncpa [#allocation5], 0 }
   0x3   :  { %15 = vsyncpa [#allocation5 + $0x1], 0  ;;  %s740_s15 = smov 0   ;;  %s742_s16 = smov 0  }
   0x4   :  { %s744_s17 = smov 0   ;;  %s746_s18 = smov 0  }
   0x5 LB: > { %s759_s19 = sadd.s32 4294967295, %s706_s18   ;;  %s762_s20 = sadd.s32 1, %s706_s18   ;;  %s706_s18 = sphi %s746_s18, %s954_s18   ;;  %s702_s17 = sphi %s744_s17, %s953_s17   ;;  %s698_s16 = sphi %s742_s16, %s952_s16   ;;  %s694_s15 = sphi %s740_s15, %s951_s15  }
   0x6   : > { %s25_s21 = ssub.s32 %s706_s18, %s762_s20  ;;  %s28_s22 = sadd.s32 1, %s702_s17 }
   0x7   : > { %p26_p0 = scmp.eq.s32.totalorder %s25_s21, 0  ;;  %p35_p1 = scmp.ne.s32.totalorder %s702_s17, %s698_s16 }
   0x8   : > { %p36_p2 = scmp.eq.s32.totalorder %s706_s18, 0  ;;  %p41_p3 = scmp.ne.s32.totalorder %s698_s16, %s694_s15 }
   0x9   : > { %s772_s23 = scalar_select %p26_p0, %s702_s17, %s28_s22  }
   0xa   : > { %p37_p4 = por %p36_p2, %p35_p1  ;;  %p42_p5 = scmp.eq.s32.totalorder %s759_s19, 0 }
   0xb   : > { %p539_p6 = scmp.lt.s32.totalorder %s706_s18, 2  ;;  %s781_s25 = sand.u32 1, %s702_s17  }
   0xc   : > { %p776_p7 = por %p42_p5, %p41_p3  ;;  %s190_s27 = sand.u32 1, %s706_s18  }
   0xd   : > { %p783_p8 = pnand %p539_p6, %p37_p4  ;;  %s498_s28 = sshll.u32 %s781_s25, 4 }
   0xe   : > { %s943_s24 = scalar_select %p776_p7, 1, 0 }
   0xf   : > { %s513_s29 = sshll.u32 %s706_s18, 8  ;;  %s194_s7 = scalar_lea.vmem [#allocation4], %s498_s28 }
  0x10   : > { %s793_s6 = scalar_lea.hbm %s938_s1, %s513_s29  ;;  %s201_s8 = sshll.u32 %s194_s7, 4  ;;  %s796_s8 = int_to_ptr.vmem [resolvable:$true] %s201_s8 }
  0x11   : > { %s799_s9 = scalar_lea.sflag [#allocation5], %s190_s27  ;;  %s584_s10 = scalar_lea.hbm %s793_s6, 256 }
  0x12   : > { %p585_p11 = scmp.ne.s32.totalorder %s793_s6, %s584_s10  ;;  %p805_p12 = pneg %p783_p8 }
  0x13   : > { %s589_s14 = scalar_lea.hbm %s938_s1, 512  ;;  %p590_p1 = scmp.lt.s32.totalorder %s793_s6, %s938_s1 }
  0x14   : > { %p587_p13 = pnand %p805_p12, %p585_p11  ;;  %p591_p2 = scmp.lt.s32.totalorder %s589_s14, %s584_s10 }
  0x16   : > { %p588_p0 = pneg %p587_p13  ;;  %p592_p3 = por %p591_p2, %p590_p1 }
  0x18   : > { %p593_p4 = pnand %p592_p3, %p588_p0 }
  0x1a   : > { %596 = shalt.err (!%p593_p4)
}
  0x1b   : > { %s597_s22 = scalar_lea.vmem %s796_s8, 256  ;;  %s708_s27 = smov [#allocation4]  }
  0x1c   : > { %p598_p5 = scmp.ne.s32.totalorder %s796_s8, %s597_s22  ;;  %s602_s28 = sshll.u32 %s708_s27, 4  ;;  %s603_s28 = int_to_ptr.vmem [resolvable:$false] %s602_s28 }
  0x1d   : > { %s604_s29 = scalar_lea.vmem %s603_s28, 512  ;;  %p605_p13 = scmp.lt.s32.totalorder %s796_s8, %s603_s28 }
  0x1e   : > { %p600_p6 = pnand %p598_p5, %p805_p12  ;;  %p606_p9 = scmp.lt.s32.totalorder %s604_s29, %s597_s22 }
  0x20   : > { %p601_p11 = pneg %p600_p6  ;;  %p607_p10 = por %p606_p9, %p605_p13 }
  0x22   : > { %p608_p7 = pnand %p607_p10, %p601_p11 }
  0x24   : > { %611 = shalt.err (!%p608_p7)
}
  0x25   : > { %s709_s30 = smov 128   ;;  %s710_s5 = smov 8  }
  0x26   : > { %535 = dma.hbm_to_vmem [thread:$0]  (!%p783_p8), %s793_s6, 256, %s796_s8, %s799_s9, %s709_s30, %s709_s30, %s710_s5  }
  0x27   : > { %p946_p9 = scmp.lt.s32.totalorder %s706_s18, 3  ;;  %p947_p7 = scmp.ge.s32.totalorder %s706_s18, 1 }
  0x28   : > { %s495_s10 = sshll.u32 %s781_s25, 5  ;;  %s512_s12 = sshll.u32 %s706_s18, 9 }
  0x29   : > { %p835_p10 = pnand %p947_p7, %p946_p9  ;;  %s844_s15 = scalar_lea.hbm %s937_s0, %s512_s12 }
  0x2a   : > { %s173_s21 = scalar_lea.vmem [#allocation2], %s495_s10  ;;  %s501_s27 = sshll.u32 %s781_s25, 2 }
  0x2b   : > { %s948_s7 = scalar_select %p835_p10, 1, 0 }
  0x2c   : > { %s180_s22 = sshll.u32 %s173_s21, 4  ;;  %s170_s6 = scalar_lea.sflag [#allocation3], %s781_s25  ;;  %s847_s22 = int_to_ptr.vmem [resolvable:$true] %s180_s22 }
  0x2d   : > { %s612_s8 = scalar_lea.hbm %s844_s15, 512  ;;  %s617_s13 = scalar_lea.hbm %s937_s0, 1024 }
  0x2e   : > { %p613_p0 = scmp.ne.s32.totalorder %s844_s15, %s612_s8  ;;  %p618_p3 = scmp.lt.s32.totalorder %s844_s15, %s937_s0 }
  0x2f   : > { %p619_p4 = scmp.lt.s32.totalorder %s617_s13, %s612_s8 }
  0x30   : > { %p615_p1 = pnand %p613_p0, %p805_p12 }
  0x31   : > { %p620_p5 = por %p619_p4, %p618_p3 }
  0x32   : > { %p616_p2 = pneg %p615_p1 }
  0x34   : > { %p621_p6 = pnand %p620_p5, %p616_p2 }
  0x36   : > { %624 = shalt.err (!%p621_p6)
}
  0x37   : > { %s625_s10 = scalar_lea.vmem %s847_s22, 512  ;;  %s711_s21 = smov [#allocation2]  }
  0x38   : > { %p626_p11 = scmp.ne.s32.totalorder %s847_s22, %s625_s10  ;;  %s630_s28 = sshll.u32 %s711_s21, 4  ;;  %s631_s28 = int_to_ptr.vmem [resolvable:$false] %s630_s28 }
  0x39   : > { %s632_s29 = scalar_lea.vmem %s631_s28, 1024  ;;  %p633_p7 = scmp.lt.s32.totalorder %s847_s22, %s631_s28 }
  0x3a   : > { %p628_p13 = pnand %p626_p11, %p805_p12  ;;  %p634_p0 = scmp.lt.s32.totalorder %s632_s29, %s625_s10 }
  0x3c   : > { %p629_p9 = pneg %p628_p13  ;;  %p635_p1 = por %p634_p0, %p633_p7 }
  0x3e   : > { %p636_p10 = pnand %p635_p1, %p629_p9 }
  0x40   : > { %639 = shalt.err (!%p636_p10)
}
  0x41   : > { %532 = dma.hbm_to_vmem [thread:$0]  (!%p783_p8), %s844_s15, 512, %s847_s22, %s170_s6, %s709_s30, %s709_s30, %s710_s5  }
  0x42   : > { %s514_s8 = sshll.u32 %s706_s18, 6  ;;  %s215_s13 = scalar_lea.vmem [#allocation6], %s501_s27 }
  0x43   : > { %s222_s12 = sshll.u32 %s215_s13, 4  ;;  %s879_s21 = scalar_lea.hbm %s939_s2, %s514_s8  ;;  %s881_s12 = int_to_ptr.vmem [resolvable:$true] %s222_s12 }
  0x44   : > { %s640_s28 = scalar_lea.hbm %s879_s21, 64  ;;  %s645_s25 = scalar_lea.hbm %s939_s2, 128 }
  0x45   : > { %p641_p10 = scmp.ne.s32.totalorder %s879_s21, %s640_s28  ;;  %p646_p4 = scmp.lt.s32.totalorder %s879_s21, %s939_s2 }
  0x46   : > { %p647_p5 = scmp.lt.s32.totalorder %s645_s25, %s640_s28 }
  0x47   : > { %p643_p2 = pnand %p641_p10, %p805_p12 }
  0x48   : > { %p648_p6 = por %p647_p5, %p646_p4 }
  0x49   : > { %p644_p3 = pneg %p643_p2 }
  0x4b   : > { %p649_p11 = pnand %p648_p6, %p644_p3 }
  0x4d   : > { %652 = shalt.err (!%p649_p11)
}
  0x4e   : > { %s653_s22 = scalar_lea.vmem %s881_s12, 64  ;;  %s712_s27 = smov [#allocation6]  }
  0x4f   : > { %p654_p13 = scmp.ne.s32.totalorder %s881_s12, %s653_s22  ;;  %s658_s6 = sshll.u32 %s712_s27, 4  ;;  %s659_s6 = int_to_ptr.vmem [resolvable:$false] %s658_s6 }
  0x50   : > { %s660_s29 = scalar_lea.vmem %s659_s6, 128  ;;  %p661_p0 = scmp.lt.s32.totalorder %s881_s12, %s659_s6 }
  0x51   : > { %p656_p9 = pnand %p654_p13, %p805_p12  ;;  %p662_p1 = scmp.lt.s32.totalorder %s660_s29, %s653_s22 }
  0x53   : > { %p657_p7 = pneg %p656_p9  ;;  %p663_p10 = por %p662_p1, %p661_p0 }
  0x55   : > { %p664_p2 = pnand %p663_p10, %p657_p7 }
  0x57   : > { %667 = shalt.err (!%p664_p2)
}
  0x58   : > { %s713_s8 = smov 32   ;;  %s714_s13 = smov 2  }
  0x59   : > { %538 = dma.hbm_to_vmem [thread:$0]  (!%p783_p8), %s879_s21, 64, %s881_s12, %s799_s9, %s713_s8, %s713_s8, %s714_s13  }
  0x5a   : > { %p949_p12 = scmp.ne.s32.totalorder %s948_s7, 0 }
  0x5b   : > { %s236_s11 = sand.u32 (!%p949_p12), 1, %s698_s16   ;;  %p950_p3 = scmp.ne.s32.totalorder (!%p949_p12), %s943_s24, 0 }
  0x5c   : > { %234 = sbr.rel (%p949_p12) target bundleno = 338 (0x152), region = 32  ;;  %s505_s14 = sshll.u32 (!%p949_p12), %s236_s11, 5 }
  0x5d   : > { %s237_s10 = scalar_lea.sflag (!%p949_p12), [#allocation3], %s236_s11  ;;  %s240_s28 = scalar_lea.vmem (!%p949_p12), [#allocation2], %s505_s14 }
  0x61   : > { %685 = dma.done.wait (%p950_p3), %s237_s10, 512  }
  0x62   : > { %687 = vsyncadd (%p950_p3), %s237_s10, 4294966784  ;;  %s245_s30 = sand.u32 1, %s759_s19   ;;  %s506_s18 = sshll.u32 %s236_s11, 4 }
  0x63   : > { %s246_s26 = scalar_lea.sflag [#allocation5], %s245_s30  ;;  %s249_s9 = scalar_lea.vmem [#allocation4], %s506_s18 }
  0x64   : > { %689 = dma.done.wait (%p950_p3), %s246_s26, 320  }
  0x65   : > { %691 = vsyncadd (%p950_p3), %s246_s26, 4294966976  ;;  %v508_v0 = vld [vmem:[%s240_s28 + $0x10] sm:$0xff]  ;;  %v509_v1 = vld [vmem:[%s240_s28 + $0x18] sm:$0xff]  ;;  %s507_s7 = sshll.u32 %s236_s11, 2  ;;  %vm335_vm0 = vcmask 130048   ;;  %p294_p8 = scmp.lt.s32.totalorder %s759_s19, 1 }
  0x66   : > { %v305_v2 = vmax.f32 %v508_v0, 1e-10  ;;  %v306_v3 = vmax.f32 %v509_v1, 1e-10  ;;  %v300_v4 = vld [vmem:[%s240_s28] sm:$0xff]  ;;  %v301_v6 = vld [vmem:[%s240_s28 + $0x8] sm:$0xff] }
  0x67   : > { %v307_v5 = vld [vmem:[%s249_s9] sm:$0xff]  ;;  %v308_v7 = vld [vmem:[%s249_s9 + $0x8] sm:$0xff]  ;;  %s258_s12 = scalar_lea.vmem [#allocation6], %s507_s7  ;;  %s956_s19 = smov (!%p294_p8, %s759_s19), 1  ;;  %vm349_vm1 = vcmask 0  }
  0x68   : > { %576 = vrcp.f32 %v305_v2  ;;  %v315_v8 = vsub.f32 %v300_v4, %v307_v5  ;;  %v316_v9 = vsub.f32 %v301_v6, %v308_v7  ;;  %v516_v10 = vld [vmem:[%s258_s12] sm:$0xf]   ;;  %s296_s25 = scalar_lea.vmem %s940_s3, %s956_s19  ;;  %s299_s27 = scalar_lea.vmem %s941_s4, %s956_s19 }
  0x69   : > { %578 = vrcp.f32 %v306_v3  ;;  %v517_v15 = vunpack.c.0.s8 %v516_v10  ;;  %v518_v18 = vunpack.c.1.s8 %v516_v10 }
  0x6a   : > { %580 = vlog2.f32 %v305_v2  ;;  %v319_v11 = vmul.f32 %v315_v8, %v315_v8  ;;  %v320_v13 = vmul.f32 %v316_v9, %v316_v9 }
  0x6b   : > { %582 = vlog2.f32 %v306_v3  ;;  %v313_v25 = vcvt.s32.f32 %v517_v15  ;;  %v314_v27 = vcvt.s32.f32 %v518_v18 }
  0x6d   : > { %v351_v35 = vsel %vm335_vm0, %v313_v25, 0.0  ;;  %v352_v36 = vsel %vm335_vm0, %v314_v27, 0.0 }
  0x6e   : > { %v353_v38 = vadd.f32 %v352_v36, %v351_v35 }
  0x75   : > { %v577_v12 = vpop.eup %576 }
  0x76   : > { %v579_v14 = vpop.eup %578  ;;  %v321_v16 = vmul.f32 0.5, %v577_v12 }
  0x77   : > { %v581_v17 = vpop.eup %580  ;;  %v322_v19 = vmul.f32 0.5, %v579_v14 }
  0x78   : > { %v583_v20 = vpop.eup %582  ;;  %v323_v21 = vmul.f32 %v321_v16, %v319_v11  ;;  %v326_v22 = vmul.f32 0.6931472, %v581_v17 }
  0x79   : > { %v324_v23 = vmul.f32 %v322_v19, %v320_v13  ;;  %v328_v24 = vmul.f32 0.6931472, %v583_v20 }
  0x7a   : > { %v329_v26 = vmul.f32 0.5, %v326_v22 }
  0x7b   : > { %v330_v28 = vmul.f32 0.5, %v328_v24 }
  0x7c   : > { %v331_v29 = vadd.f32 %v329_v26, %v323_v21 }
  0x7d   : > { %v332_v30 = vadd.f32 %v330_v28, %v324_v23 }
  0x7e   : > { %v333_v31 = vmul.f32 %v331_v29, %v313_v25 }
  0x7f   : > { %v334_v32 = vmul.f32 %v332_v30, %v314_v27 }
  0x80   : > { %v336_v33 = vsel %vm335_vm0, %v333_v31, 0.0 }
  0x81   : > { %v337_v34 = vsel %vm335_vm0, %v334_v32, 0.0 }
  0x82   : > { %v338_v37 = vadd.f32 %v337_v34, %v336_v33 }
  0x84   : > { %339 = vadd.xlane.f32.xlu0 %v338_v37 }
  0x88   : > { %354 = vadd.xlane.f32.xlu0 %v353_v38 }
 0x10d   : > { %v340_v39 = vpop.xlane.xlu0 %339 }
 0x10e   : > { %v341_v40 = vrot.slane %v340_v39, 4 }
 0x110   : > { %v342_v41 = vadd.f32 %v341_v40, %v340_v39 }
 0x111   : > { %v355_v42 = vpop.xlane.xlu0 %354 }
 0x112   : > { %v343_v43 = vrot.slane %v342_v41, 2  ;;  %v356_v44 = vrot.slane %v355_v42, 4 }
 0x114   : > { %v357_v45 = vadd.f32 %v356_v44, %v355_v42  ;;  %v344_v46 = vadd.f32 %v343_v43, %v342_v41 }
 0x116   : > { %v358_v47 = vrot.slane %v357_v45, 2  ;;  %v345_v48 = vrot.slane %v344_v46, 1 }
 0x118   : > { %v359_v49 = vadd.f32 %v358_v47, %v357_v45  ;;  %v346_v50 = vadd.f32 %v345_v48, %v344_v46 }
 0x11a   : > { %519 = vpush %v346_v50  ;;  %v360_v51 = vrot.slane %v359_v49, 1 }
 0x11c   : > { %v361_v52 = vadd.f32 %v360_v51, %v359_v49 }
 0x11e   : > { %521 = vpush %v361_v52 }
 0x14b   : > { %s520_s5 = spop %519 }
 0x14c   : > { %v348_v53 = vstv %s520_s5 }
 0x14d   : > { %350 = vst.msk [vmem:[%s296_s25] sm:$0x1] %vm349_vm1, %v348_v53 }
 0x14f   : > { %s522_s6 = spop %521 }
 0x150   : > { %v363_v54 = vstv %s522_s6 }
 0x151   : > { %364 = vst.msk [vmem:[%s299_s27] sm:$0x1] %vm349_vm1, %v363_v54 }
 0x152 PF: > { %p18_p4 = scmp.ge.s32.totalorder %s762_s20, 4   ;;  %s951_s15 = smov %s698_s16 }
 0x153   : > { %s952_s16 = smov %s702_s17  ;;  %s953_s17 = smov %s772_s23 }
 0x154   : > { %s954_s18 = smov %s762_s20  ;;  %20 = sbr.rel (!%p18_p4) target bundleno = 5 (0x5), region = 109 }
 0x159   :  { %394 = vsyncpa [#allocation3], 1 }
 0x15a   :  { %396 = vsyncpa [#allocation3 + $0x1], 1 }
 0x15b   :  { %397 = vsyncpa [#allocation5], 1 }
 0x15c   :  { %399 = vsyncpa [#allocation5 + $0x1], 1 }

</bundles_post_ra>
